<compile_context>
chip_gen: v7x
topology: tpu7x:2x2x1
jax: 0.10.0
libtpu: 0.0.40
codegen_flags: <defaults>
</compile_context>

<pallas_src>
import jax
import jax.numpy as jnp
from jax import lax
from jax.experimental import pallas as pl
from jax.experimental.pallas import tpu as pltpu

NUM_CLASSES = 3
GAMMA = 2.0          # kernel hard-codes gamma=2 as q*q (pow -> multiply)
EPS = 1e-7


def _round_up(v, m):
    return (v + m - 1) // m * m


# ----------------------------------------------------------------------------
# Shared in-kernel blocks (feature-major / lane-dense dataflow)
# ----------------------------------------------------------------------------
def _mlp_logits_t(x_tile, w1t, b1, w2t, b2, w3t, b3, mxu_dtype):
    """x_tile [tm, D] f32 -> logits^T [3, tm] f32 (batch on the lane axis).

    MXU operands are cast to `mxu_dtype` (bf16 by default on v6e/v7x); all
    accumulation, bias adds and tanh stay f32 (v5e has no bf16 VPU/EUP path).
    """
    xt = x_tile.T.astype(mxu_dtype)                            # [D, tm]

    def mm(a, b):
        return jnp.dot(a.astype(mxu_dtype), b,
                       preferred_element_type=jnp.float32)

    h = jnp.tanh(mm(w1t, xt) + b1)                             # [20, tm] f32
    h = jnp.tanh(mm(w2t, h.astype(mxu_dtype)) + b2)            # [40, tm] f32
    return mm(w3t, h.astype(mxu_dtype)) + b3                   # [3, tm]  f32


def _focal_loss_rows(logits_t, labels, valid):
    """Per-sample focal loss (gamma=2) from lane-dense logits.

    logits_t [3, tm] f32, labels [1, tm] i32, valid [1, tm] bool -> [1, tm] f32.
    Class reduction is 3 explicit VPU rows (no XLU), one log per sample,
    (1-p)^2 as q*q, EUP approx reciprocal.  Invalid lanes (ragged tail /
    overflow tiles) are zeroed BEFORE any reduction so OOB garbage that went
    through exp/log never reaches the accumulator.
    """
    x0, x1, x2 = logits_t[0:1, :], logits_t[1:2, :], logits_t[2:3, :]
    m = jnp.maximum(jnp.maximum(x0, x1), x2)
    e0 = jnp.exp(x0 - m)
    e1 = jnp.exp(x1 - m)
    e2 = jnp.exp(x2 - m)
    s = e0 + e1 + e2
    e_t = jnp.where(labels == 0, e0, jnp.where(labels == 1, e1, e2))
    p_t = jnp.clip(e_t * pl.reciprocal(s, approx=True), EPS, 1.0 - EPS)
    q = 1.0 - p_t
    loss = q * q * (-jnp.log(p_t))
    return jnp.where(valid, loss, 0.0)


def _prep_params(params):
    """Transpose weights to feature-major and make biases [h, 1] columns."""
    w1, b1, w2, b2, w3, b3 = params
    h1, h2, c = w1.shape[1], w2.shape[1], w3.shape[1]
    f32 = jnp.float32
    prepped = (w1.T.astype(f32), b1.reshape(h1, 1).astype(f32),
               w2.T.astype(f32), b2.reshape(h2, 1).astype(f32),
               w3.T.astype(f32), b3.reshape(c, 1).astype(f32))
    return prepped, (h1, h2, c)


# ----------------------------------------------------------------------------
# Network.forward : fused 3-layer MLP kernel (feature-major)
# ----------------------------------------------------------------------------
def _make_fwd_kernel(mxu_dtype):
    def kernel(x_ref, w1t_ref, b1_ref, w2t_ref, b2_ref, w3t_ref, b3_ref, out_ref):
        logits_t = _mlp_logits_t(x_ref[...], w1t_ref[...], b1_ref[...],
                                 w2t_ref[...], b2_ref[...],
                                 w3t_ref[...], b3_ref[...], mxu_dtype)
        out_ref[...] = logits_t.astype(out_ref.dtype)          # lane-dense [3, tm] store
    return kernel


def network_forward(x, params, *, tm=4096, mxu_dtype=jnp.bfloat16):
    """Network.forward.  x: [N, D] f32.  params in x @ W + b orientation:
    (w1 [D,20], b1 [20], w2 [20,40], b2 [40], w3 [40,3], b3 [3]).
    Returns logits [N, 3] f32 (module convention)."""
    n, d = x.shape
    (w1t, b1c, w2t, b2c, w3t, b3c), (h1, h2, c) = _prep_params(params)

    tm = _round_up(max(128, min(tm, _round_up(n, 128))), 128)
    grid = (pl.cdiv(n, tm),)                                   # no host-side padding

    logits_t = pl.pallas_call(
        _make_fwd_kernel(mxu_dtype),
        out_shape=jax.ShapeDtypeStruct((c, n), jnp.float32),
        grid=grid,
        in_specs=[
            pl.BlockSpec((tm, d), lambda i: (i, 0)),           # batch tile of x
            pl.BlockSpec((h1, d), lambda i: (0, 0)),           # resident transposed weights
            pl.BlockSpec((h1, 1), lambda i: (0, 0)),
            pl.BlockSpec((h2, h1), lambda i: (0, 0)),
            pl.BlockSpec((h2, 1), lambda i: (0, 0)),
            pl.BlockSpec((c, h2), lambda i: (0, 0)),
            pl.BlockSpec((c, 1), lambda i: (0, 0)),
        ],
        out_specs=pl.BlockSpec((c, tm), lambda i: (0, i)),     # lane-dense [3, tm]
        compiler_params=pltpu.CompilerParams(
            dimension_semantics=("parallel",),                 # megacore-shard the batch
            vmem_limit_bytes=32 * 1024 * 1024,
        ),
    )(x.astype(jnp.float32), w1t, b1c, w2t, b2c, w3t, b3c)

    # [3, N] -> [N, 3] to match the PyTorch module's output convention.  The hot
    # loop already stored lane-dense tiles; this relayout is only 12 B/sample.
    return logits_t.T


# ----------------------------------------------------------------------------
# Fused Network.forward + FocalLoss(gamma=2).mean()  (single pallas_call)
# ----------------------------------------------------------------------------
def network_forward_focal_loss(x, y_true, params, *, tm=4096,
                               mxu_dtype=jnp.bfloat16, num_cores=2):
    """Returns (logits [N, 3] f32, loss scalar f32).

    Grid = (core, tile): the core axis is 'parallel' (dual-TC partial sums on
    v7x, harmless on v5e/v6e), the batch-tile axis is 'arbitrary' and carries a
    wide [1, tm] VMEM loss accumulator reduced cross-lane once per core.
    """
    n, d = x.shape
    (w1t, b1c, w2t, b2c, w3t, b3c), (h1, h2, c) = _prep_params(params)
    assert c == NUM_CLASSES

    tm = _round_up(max(128, min(tm, _round_up(n, 128))), 128)
    total_tiles = pl.cdiv(n, tm)
    n_cores = num_cores if total_tiles >= num_cores else 1
    tpc = pl.cdiv(total_tiles, n_cores)      # tiles per core (last core may run one
                                             # clamped "overflow" tile, masked below)

    lab = y_true.astype(jnp.int32).reshape(1, n)

    def tile_idx(cc, t):
        # Clamp the virtual tile index so the (at most one) overflow iteration
        # re-reads/re-writes the last real tile with identical values; its loss
        # contribution is masked out in the kernel.
        return jnp.minimum(cc * tpc + t, total_tiles - 1)

    def kernel(x_ref, lab_ref, w1t_ref, b1_ref, w2t_ref, b2_ref, w3t_ref, b3_ref,
               logits_ref, partial_ref, acc_ref):
        cc = pl.program_id(0)
        t = pl.program_id(1)

        @pl.when(t == 0)
        def _():
            acc_ref[...] = jnp.zeros_like(acc_ref)

        logits_t = _mlp_logits_t(x_ref[...], w1t_ref[...], b1_ref[...],
                                 w2t_ref[...], b2_ref[...],
                                 w3t_ref[...], b3_ref[...], mxu_dtype)
        logits_ref[...] = logits_t.astype(logits_ref.dtype)    # lane-dense store

        i_virt = cc * tpc + t
        i_real = jnp.minimum(i_virt, total_tiles - 1)
        col = i_real * tm + lax.broadcasted_iota(jnp.int32, (1, tm), 1)
        valid = jnp.logical_and(col < n, i_virt < total_tiles)

        # Wide elementwise accumulator (VPU add rides in slack next to EUP work).
        acc_ref[...] += _focal_loss_rows(logits_t, lab_ref[...], valid)

        @pl.when(t == tpc - 1)
        def _():
            s = jnp.sum(acc_ref[...], axis=1, keepdims=True)   # one XLU reduce / core
            partial_ref[...] = jnp.broadcast_to(s, partial_ref.shape)

    logits_t, partials = pl.pallas_call(
        kernel,
        out_shape=(jax.ShapeDtypeStruct((c, n), jnp.float32),
                   jax.ShapeDtypeStruct((1, 128 * n_cores), jnp.float32)),
        grid=(n_cores, tpc),
        in_specs=[
            pl.BlockSpec((tm, d), lambda cc, t: (tile_idx(cc, t), 0)),
            pl.BlockSpec((1, tm), lambda cc, t: (0, tile_idx(cc, t))),
            pl.BlockSpec((h1, d), lambda cc, t: (0, 0)),
            pl.BlockSpec((h1, 1), lambda cc, t: (0, 0)),
            pl.BlockSpec((h2, h1), lambda cc, t: (0, 0)),
            pl.BlockSpec((h2, 1), lambda cc, t: (0, 0)),
            pl.BlockSpec((c, h2), lambda cc, t: (0, 0)),
            pl.BlockSpec((c, 1), lambda cc, t: (0, 0)),
        ],
        out_specs=(
            pl.BlockSpec((c, tm), lambda cc, t: (0, tile_idx(cc, t))),  # lane-dense logits
            pl.BlockSpec((1, 128), lambda cc, t: (0, cc)),              # per-core partial sum
        ),
        scratch_shapes=[pltpu.VMEM((1, tm), jnp.float32)],
        compiler_params=pltpu.CompilerParams(
            dimension_semantics=("parallel", "arbitrary"),
            vmem_limit_bytes=32 * 1024 * 1024,
        ),
    )(x.astype(jnp.float32), lab, w1t, b1c, w2t, b2c, w3t, b3c)

    # Add the per-core partials and divide ONCE by the total N*C
    # (matches FocalLoss(...).mean() over the [N, C] one-hot-masked matrix).
    per_core = partials.reshape(n_cores, 128)[:, 0]
    loss = jnp.sum(per_core) / jnp.float32(n * NUM_CLASSES)
    return logits_t.T, loss


# ----------------------------------------------------------------------------
# Pure-JAX references
# ----------------------------------------------------------------------------
def network_forward_ref(x, params, mxu_dtype=jnp.float32):
    w1, b1, w2, b2, w3, b3 = params

    def mm(a, b):
        return jnp.dot(a.astype(mxu_dtype), b.astype(mxu_dtype),
                       preferred_element_type=jnp.float32)

    h = jnp.tanh(mm(x, w1) + b1)
    h = jnp.tanh(mm(h, w2) + b2)
    return mm(h, w3) + b3


def focal_loss_ref(y_hat, y_true):
    one_hot = jnp.eye(NUM_CLASSES, dtype=jnp.float32)[y_true]
    p = jnp.clip(jax.nn.softmax(y_hat, axis=1), EPS, 1.0 - EPS)
    loss = -1.0 * (1.0 - p) ** GAMMA * one_hot * jnp.log(p)
    return loss.mean()


if __name__ == "__main__":
    key = jax.random.PRNGKey(0)
    ks = jax.random.split(key, 8)

    N, D = 300, 16          # ragged batch: exercises edge blocks (no host padding)
    x = jax.random.normal(ks[0], (N, D), dtype=jnp.float32)
    params = (
        jax.random.normal(ks[1], (D, 20), dtype=jnp.float32) * 0.3,
        jax.random.normal(ks[2], (20,), dtype=jnp.float32) * 0.1,
        jax.random.normal(ks[3], (20, 40), dtype=jnp.float32) * 0.3,
        jax.random.normal(ks[4], (40,), dtype=jnp.float32) * 0.1,
        jax.random.normal(ks[5], (40, 3), dtype=jnp.float32) * 0.3,
        jax.random.normal(ks[6], (3,), dtype=jnp.float32) * 0.1,
    )
    y_true = jax.random.randint(ks[7], (N,), 0, NUM_CLASSES, dtype=jnp.int32)

    ref_logits_f32 = network_forward_ref(x, params)
    ref_loss_f32 = focal_loss_ref(ref_logits_f32, y_true)

    # ---- f32 MXU-operand path: tight checks (module-faithful precision) ------
    # tm=128 forces multiple tiles -> multi-step 'parallel' grid in the forward.
    logits = jax.block_until_ready(
        network_forward(x, params, tm=128, mxu_dtype=jnp.float32))
    assert jnp.allclose(logits, ref_logits_f32, rtol=2e-3, atol=2e-3), "fwd f32 mismatch"

    # tm=128 -> grid (2 cores, 2 tiles/core) incl. one clamped overflow tile and
    # a ragged last tile (exercises the dual-TC partial-sum + masking paths).
    fused_logits, fused_loss = network_forward_focal_loss(
        x, y_true, params, tm=128, mxu_dtype=jnp.float32)
    jax.block_until_ready((fused_logits, fused_loss))
    assert jnp.allclose(fused_logits, ref_logits_f32, rtol=2e-3, atol=2e-3), "fused fwd mismatch"
    # loss uses the EUP approx reciprocal -> deliberately loosened rtol
    assert jnp.allclose(fused_loss, ref_loss_f32, rtol=2e-2, atol=1e-3), \
        (fused_loss, ref_loss_f32)

    # ---- default fast path (bf16 MXU operands, f32 accumulate) ---------------
    # Compare against a bf16-operand JAX reference so operand rounding matches.
    ref_logits_bf16 = network_forward_ref(x, params, mxu_dtype=jnp.bfloat16)
    ref_loss_bf16 = focal_loss_ref(ref_logits_bf16, y_true)

    logits_bf16 = jax.block_until_ready(network_forward(x, params))
    assert jnp.allclose(logits_bf16, ref_logits_bf16, rtol=5e-3, atol=5e-3), "fwd bf16 mismatch"

    _, loss_bf16 = network_forward_focal_loss(x, y_true, params)
    jax.block_until_ready(loss_bf16)
    assert jnp.allclose(loss_bf16, ref_loss_bf16, rtol=2e-2, atol=1e-3), \
        (loss_bf16, ref_loss_bf16)

    print("KERNEL_OK")
</pallas_src>

<mosaic_0001>
module attributes {stable_mosaic.version = 11 : i64} {
  func.func @kernel(%arg0: i32, %arg1: memref<128x16xf32, #tpu.memory_space<vmem>>, %arg2: memref<20x16xf32, #tpu.memory_space<vmem>>, %arg3: memref<20x1xf32, #tpu.memory_space<vmem>>, %arg4: memref<40x20xf32, #tpu.memory_space<vmem>>, %arg5: memref<40x1xf32, #tpu.memory_space<vmem>>, %arg6: memref<3x40xf32, #tpu.memory_space<vmem>>, %arg7: memref<3x1xf32, #tpu.memory_space<vmem>>, %arg8: memref<3x128xf32, #tpu.memory_space<vmem>>) attributes {dimension_semantics = [#tpu.dimension_semantics<parallel>], iteration_bounds = array<i64: 3>, scalar_prefetch = 0 : i64, scratch_operands = 0 : i64, tpu.core_type = #tpu.core_type<tc>, window_params = [{transform_indices = @transform_0, window_bounds = array<i64: 128, 16>}, {pipeline_mode = #tpu.pipeline_mode<synchronous>, transform_indices = @transform_1, window_bounds = array<i64: 20, 16>}, {pipeline_mode = #tpu.pipeline_mode<synchronous>, transform_indices = @transform_2, window_bounds = array<i64: 20, 1>}, {pipeline_mode = #tpu.pipeline_mode<synchronous>, transform_indices = @transform_3, window_bounds = array<i64: 40, 20>}, {pipeline_mode = #tpu.pipeline_mode<synchronous>, transform_indices = @transform_4, window_bounds = array<i64: 40, 1>}, {pipeline_mode = #tpu.pipeline_mode<synchronous>, transform_indices = @transform_5, window_bounds = array<i64: 3, 40>}, {pipeline_mode = #tpu.pipeline_mode<synchronous>, transform_indices = @transform_6, window_bounds = array<i64: 3, 1>}, {transform_indices = @transform_7, window_bounds = array<i64: 3, 128>}]} {
    %c0 = arith.constant 0 : index
    %c0_0 = arith.constant 0 : index
    %0 = vector.load %arg1[%c0, %c0_0] : memref<128x16xf32, #tpu.memory_space<vmem>>, vector<128x16xf32>
    %c0_1 = arith.constant 0 : index
    %c0_2 = arith.constant 0 : index
    %1 = vector.load %arg2[%c0_1, %c0_2] : memref<20x16xf32, #tpu.memory_space<vmem>>, vector<20x16xf32>
    %c0_3 = arith.constant 0 : index
    %c0_4 = arith.constant 0 : index
    %2 = vector.load %arg3[%c0_3, %c0_4] : memref<20x1xf32, #tpu.memory_space<vmem>>, vector<20x1xf32>
    %c0_5 = arith.constant 0 : index
    %c0_6 = arith.constant 0 : index
    %3 = vector.load %arg4[%c0_5, %c0_6] : memref<40x20xf32, #tpu.memory_space<vmem>>, vector<40x20xf32>
    %c0_7 = arith.constant 0 : index
    %c0_8 = arith.constant 0 : index
    %4 = vector.load %arg5[%c0_7, %c0_8] : memref<40x1xf32, #tpu.memory_space<vmem>>, vector<40x1xf32>
    %c0_9 = arith.constant 0 : index
    %c0_10 = arith.constant 0 : index
    %5 = vector.load %arg6[%c0_9, %c0_10] : memref<3x40xf32, #tpu.memory_space<vmem>>, vector<3x40xf32>
    %c0_11 = arith.constant 0 : index
    %c0_12 = arith.constant 0 : index
    %6 = vector.load %arg7[%c0_11, %c0_12] : memref<3x1xf32, #tpu.memory_space<vmem>>, vector<3x1xf32>
    %7 = tpu.transpose %0, [1, 0] : vector<128x16xf32> -> vector<16x128xf32>
    %cst = arith.constant dense<0.000000e+00> : vector<20x128xf32>
    %8 = tpu.matmul %1, %7, %cst {dimension_numbers = #tpu.dot_dimension_numbers<[1], [0], [0], [1], [0, 0, 1, 1], [], []>} : vector<20x16xf32>, vector<16x128xf32>, vector<20x128xf32> -> vector<20x128xf32>
    %9 = vector.broadcast %2 : vector<20x1xf32> to vector<20x128xf32>
    %10 = arith.addf %8, %9 : vector<20x128xf32>
    %11 = math.tanh %10 : vector<20x128xf32>
    %cst_13 = arith.constant dense<0.000000e+00> : vector<40x128xf32>
    %12 = tpu.matmul %3, %11, %cst_13 {dimension_numbers = #tpu.dot_dimension_numbers<[1], [0], [0], [1], [0, 0, 1, 1], [], []>} : vector<40x20xf32>, vector<20x128xf32>, vector<40x128xf32> -> vector<40x128xf32>
    %13 = vector.broadcast %4 : vector<40x1xf32> to vector<40x128xf32>
    %14 = arith.addf %12, %13 : vector<40x128xf32>
    %15 = math.tanh %14 : vector<40x128xf32>
    %cst_14 = arith.constant dense<0.000000e+00> : vector<3x128xf32>
    %16 = tpu.matmul %5, %15, %cst_14 {dimension_numbers = #tpu.dot_dimension_numbers<[1], [0], [0], [1], [0, 0, 1, 1], [], []>} : vector<3x40xf32>, vector<40x128xf32>, vector<3x128xf32> -> vector<3x128xf32>
    %17 = vector.broadcast %6 : vector<3x1xf32> to vector<3x128xf32>
    %18 = arith.addf %16, %17 : vector<3x128xf32>
    %c0_15 = arith.constant 0 : index
    %c0_16 = arith.constant 0 : index
    %19 = vector.load %arg8[%c0_15, %c0_16] : memref<3x128xf32, #tpu.memory_space<vmem>>, vector<3x128xf32>
    tpu.vector_store %arg8[%c0_15, %c0_16], %18 {strides = array<i32>} : memref<3x128xf32, #tpu.memory_space<vmem>>, vector<3x128xf32>,
    return
  }
  func.func @transform_0(%arg0: i32) -> (i32, i32) {
    %c0_i32 = arith.constant 0 : i32
    %c0_i32_0 = arith.constant 0 : i32
    return %arg0, %c0_i32 : i32, i32
  }
  func.func @transform_1(%arg0: i32) -> (i32, i32) {
    %c0_i32 = arith.constant 0 : i32
    %c0_i32_0 = arith.constant 0 : i32
    %c0_i32_1 = arith.constant 0 : i32
    return %c0_i32, %c0_i32_0 : i32, i32
  }
  func.func @transform_2(%arg0: i32) -> (i32, i32) {
    %c0_i32 = arith.constant 0 : i32
    %c0_i32_0 = arith.constant 0 : i32
    %c0_i32_1 = arith.constant 0 : i32
    return %c0_i32, %c0_i32_0 : i32, i32
  }
  func.func @transform_3(%arg0: i32) -> (i32, i32) {
    %c0_i32 = arith.constant 0 : i32
    %c0_i32_0 = arith.constant 0 : i32
    %c0_i32_1 = arith.constant 0 : i32
    return %c0_i32, %c0_i32_0 : i32, i32
  }
  func.func @transform_4(%arg0: i32) -> (i32, i32) {
    %c0_i32 = arith.constant 0 : i32
    %c0_i32_0 = arith.constant 0 : i32
    %c0_i32_1 = arith.constant 0 : i32
    return %c0_i32, %c0_i32_0 : i32, i32
  }
  func.func @transform_5(%arg0: i32) -> (i32, i32) {
    %c0_i32 = arith.constant 0 : i32
    %c0_i32_0 = arith.constant 0 : i32
    %c0_i32_1 = arith.constant 0 : i32
    return %c0_i32, %c0_i32_0 : i32, i32
  }
  func.func @transform_6(%arg0: i32) -> (i32, i32) {
    %c0_i32 = arith.constant 0 : i32
    %c0_i32_0 = arith.constant 0 : i32
    %c0_i32_1 = arith.constant 0 : i32
    return %c0_i32, %c0_i32_0 : i32, i32
  }
  func.func @transform_7(%arg0: i32) -> (i32, i32) {
    %c0_i32 = arith.constant 0 : i32
    %c0_i32_0 = arith.constant 0 : i32
    return %c0_i32, %arg0 : i32, i32
  }
}

</mosaic_0001>

<bundles_post_ra>
// kernel: tpu_custom_call.1
= control target key start
LH: loop header
LB: loop body
LE: loop exit
PB: predicated region body
PF: predicated region fallthrough
CT: control target
= control target key end

     0   :  { %12 = vsyncpa [#allocation3], 0  ;;  %s1365_s0 = inlined_call_operand.vmem [shape: f32[300,16], index: 0, kind: input, shape index: {}]   ;;  %s1366_s1 = inlined_call_operand.vmem [shape: f32[20,16], index: 1, kind: input, shape index: {}]   ;;  %s1367_s2 = inlined_call_operand.vmem [shape: f32[20,1], index: 2, kind: input, shape index: {}]   ;;  %s1368_s3 = inlined_call_operand.vmem [shape: f32[40,20], index: 3, kind: input, shape index: {}]   ;;  %s1369_s4 = inlined_call_operand.vmem [shape: f32[40,1], index: 4, kind: input, shape index: {}]   ;;  %s1370_s5 = inlined_call_operand.vmem [shape: f32[3,40], index: 5, kind: input, shape index: {}]   ;;  %s1371_s6 = inlined_call_operand.vmem [shape: f32[3,1], index: 6, kind: input, shape index: {}]   ;;  %s1372_s7 = inlined_call_operand.hbm [shape: f32[3,300], index: 7, kind: output, shape index: {}]  }
   0x1   :  { %14 = vsyncpa [#allocation3 + $0x1], 0  ;;  %s1138_s24 = smov 0   ;;  %s1140_s25 = smov 0  }
   0x2   :  { %s1142_s26 = smov 0   ;;  %s1144_s27 = smov 0  }
   0x3 LB: > { %s1159_s28 = sadd.s32 4294967295, %s1091_s27   ;;  %s782_s29 = sadd.s32 4294967294, %s1091_s27   ;;  %s1091_s27 = sphi %s1144_s27, %s1380_s27   ;;  %s1087_s26 = sphi %s1142_s26, %s1379_s26   ;;  %s1083_s25 = sphi %s1140_s25, %s1378_s25   ;;  %s1079_s24 = sphi %s1138_s24, %s1377_s24  }
   0x4   : > { %s1163_s30 = sadd.s32 1, %s1091_s27   ;;  %s179_s8 = sadd.s32 1, %s1087_s26 }
   0x5   : > { %s176_s9 = ssub.s32 %s1091_s27, %s1163_s30  ;;  %p189_p0 = scmp.ne.s32.totalorder %s1087_s26, %s1083_s25 }
   0x6   : > { %p177_p1 = scmp.eq.s32.totalorder %s176_s9, 0  ;;  %p190_p2 = scmp.eq.s32.totalorder %s1159_s28, 2 }
   0x7   : > { %p195_p3 = scmp.ne.s32.totalorder %s1083_s25, %s1079_s24  ;;  %p196_p4 = scmp.eq.s32.totalorder %s782_s29, 2 }
   0x8   : > { %s1174_s10 = scalar_select %p177_p1, %s1087_s26, %s179_s8  }
   0x9   : > { %p1176_p5 = por %p190_p2, %p189_p0  ;;  %p1180_p6 = por %p196_p4, %p195_p3 }
   0xa   : > { %p785_p7 = scmp.ge.s32.totalorder %s1091_s27, 1  ;;  %p249_p8 = scmp.lt.s32.totalorder %s1091_s27, 4 }
   0xc   : > { %p250_p9 = pnand %p785_p7, %p249_p8 }
   0xd   : > { %s787_s13 = sshll.u32 (!%p250_p9), %s1159_s28, 4  ;;  %v1093_v0 = vmov (!%p250_p9), 0.0|0.0   ;;  %vm1094_vm0 = vmmov (!%p250_p9), 0   ;;  %v1095_v1 = vmov (!%p250_p9), 0.0   ;;  %v1096_v2 = vmov (!%p250_p9), 0   ;;  %v318_v3 = vld [vmem:[%s1367_s2] sm:$0xff] (!%p250_p9) }
   0xe   : > { %253 = sbr.rel (%p250_p9) target bundleno = 798 (0x31e), region = 48  ;;  %927 = vmatprep.subr.bf16.mxu0 (!%p250_p9), %v1093_v0  ;;  %p290_p10 = scmp.lt.s32.totalorder (!%p250_p9), %s787_s13, 37  ;;  %884 = vmatprep.mubr.msk.f32.mxu0 (!%p250_p9), %vm1094_vm0, %v1095_v1  ;;  %v320_v4 = vld [vmem:[%s1367_s2 + $0x10] sm:$0xf] (!%p250_p9)  ;;  %vm348_vm1 = vcmask (!%p250_p9), 130048   ;;  %v319_v5 = vld [vmem:[%s1367_s2 + $0x8] sm:$0xff] (!%p250_p9) }
   0xf   : > { %1011 = vset.pattern.permute.xlu0 (!%p250_p9), %v1096_v2  ;;  %1012 = vset.pattern.permute.xlu1 (!%p250_p9), %v1096_v2  ;;  %v326_v6 = vld [vmem:[%s1369_s4] sm:$0xff] (!%p250_p9)  ;;  %vm1214_vm2 = vmpackc.low (!%p250_p9), %vm348_vm1, %vm348_vm1  ;;  %v327_v11 = vld [vmem:[%s1369_s4 + $0x8] sm:$0xff] (!%p250_p9)  ;;  %vm530_vm3 = vcmask (!%p250_p9), 1043456   ;;  %vm514_vm4 = vcmask (!%p250_p9), 162816   ;;  %vm634_vm5 = vcmask (!%p250_p9), 326656   ;;  %s816_s14 = sshll.u32 (!%p250_p9), %s1159_s28, 6 }
  0x10   : > { %335 = vperm.xlu0 (!%p250_p9), %1011, %v318_v3   ;;  %959 = vmatprep.subr.bf16.mxu1 (!%p250_p9), %v1093_v0  ;;  %v328_v12 = vld [vmem:[%s1369_s4 + $0x10] sm:$0xff] (!%p250_p9)  ;;  %v329_v15 = vld [vmem:[%s1369_s4 + $0x18] sm:$0xff] (!%p250_p9)  ;;  %v330_v16 = vld [vmem:[%s1369_s4 + $0x20] sm:$0xff] (!%p250_p9)  ;;  %s1323_s19 = scalar_lea.hbm (!%p250_p9), %s1372_s7, %s816_s14  ;;  %s1097_s28 = smov (!%p250_p9), [#allocation2]  }
  0x11   : > { %345 = vperm.xlu1 (!%p250_p9), %1012, %v320_v4   ;;  %899 = vmatprep.mubr.msk.f32.mxu1 (!%p250_p9), %vm1094_vm0, %v1095_v1  ;;  %v332_v18 = vld [vmem:[%s1371_s6] sm:$0x7] (!%p250_p9)  ;;  %v316_v38 = vld [vmem:[%s1366_s1 + $0x8] sm:$0xff] (!%p250_p9)  ;;  %v317_v39 = vld [vmem:[%s1366_s1 + $0x10] sm:$0xf] (!%p250_p9)  ;;  %s1033_s22 = sshll.u32 (!%p250_p9), %s1097_s28, 4  ;;  %s1034_s22 = int_to_ptr.vmem [resolvable:$false] %s1033_s22 }
  0x12   : > { %v315_v37 = vld [vmem:[%s1366_s1] sm:$0xff] (!%p250_p9)  ;;  %v322_v57 = vld [vmem:[%s1368_s3 + $0x8] sm:$0xff] (!%p250_p9)  ;;  %v323_v58 = vld [vmem:[%s1368_s3 + $0x10] sm:$0xff] (!%p250_p9)  ;;  %s1035_s23 = scalar_lea.vmem (!%p250_p9), %s1034_s22, 128 }
  0x13   : > { %v321_v56 = vld [vmem:[%s1368_s3] sm:$0xff] (!%p250_p9)  ;;  %v324_v59 = vld [vmem:[%s1368_s3 + $0x18] sm:$0xff] (!%p250_p9) }
  0x14   : > { %340 = vperm.xlu0 (!%p250_p9), %1011, %v319_v5   ;;  %v325_v60 = vld [vmem:[%s1368_s3 + $0x20] sm:$0xff] (!%p250_p9) }
  0x15   : > { %s1382_s13 = smov (!%p290_p10, %s787_s13), 37  ;;  %491 = vperm.xlu1 %1012, %v326_v6  }
  0x16   : > { %s788_s20 = sshll.u32 %s1382_s13, 3 }
  0x17   : > { %s1208_s8 = scalar_lea.vmem %s1365_s0, %s788_s20 }
  0x18   : > { %v299_v7 = vld [vmem:[%s1208_s8] sm:$0xff]  ;;  %v300_v8 = vld [vmem:[%s1208_s8 + $0x8] sm:$0xff]  ;;  %v301_v13 = vld [vmem:[%s1208_s8 + $0x10] sm:$0xff]  ;;  %496 = vperm.xlu0 %1011, %v327_v11  }
  0x19   : > { %v928_v10 = vpack.c.bf16 %v300_v8, %v299_v7  ;;  %v302_v14 = vld [vmem:[%s1208_s8 + $0x18] sm:$0xff]  ;;  %501 = vperm.xlu1 %1012, %v328_v12   ;;  %v303_v19 = vld [vmem:[%s1208_s8 + $0x20] sm:$0xff]  ;;  %v304_v20 = vld [vmem:[%s1208_s8 + $0x28] sm:$0xff] }
  0x1a   : > { %v932_v17 = vpack.c.bf16 %v302_v14, %v301_v13  ;;  %v936_v21 = vpack.c.bf16 %v304_v20, %v303_v19  ;;  %v305_v22 = vld [vmem:[%s1208_s8 + $0x30] sm:$0xff]  ;;  %v306_v23 = vld [vmem:[%s1208_s8 + $0x38] sm:$0xff]  ;;  %v307_v25 = vld [vmem:[%s1208_s8 + $0x40] sm:$0xff] }
  0x1b   : > { %930 = vmatpush3.bf16.xpose.msk.msra.mxu0 %vm1214_vm2, %v928_v10  ;;  %v940_v24 = vpack.c.bf16 %v306_v23, %v305_v22  ;;  %v308_v26 = vld [vmem:[%s1208_s8 + $0x48] sm:$0xff]  ;;  %v309_v28 = vld [vmem:[%s1208_s8 + $0x50] sm:$0xff]  ;;  %v310_v29 = vld [vmem:[%s1208_s8 + $0x58] sm:$0xff] }
  0x1c   : > { %931 = vmatprep.subr.bf16.mxu0 %v1093_v0  ;;  %506 = vperm.xlu0 %1011, %v329_v15   ;;  %v944_v27 = vpack.c.bf16 %v308_v26, %v307_v25  ;;  %v948_v30 = vpack.c.bf16 %v310_v29, %v309_v28  ;;  %v311_v31 = vld [vmem:[%s1208_s8 + $0x60] sm:$0xff]  ;;  %v312_v32 = vld [vmem:[%s1208_s8 + $0x68] sm:$0xff]  ;;  %v313_v34 = vld [vmem:[%s1208_s8 + $0x70] sm:$0xff] }
  0x1d   : > { %511 = vperm.xlu1 %1012, %v330_v16   ;;  %v952_v33 = vpack.c.bf16 %v312_v32, %v311_v31  ;;  %v314_v35 = vld [vmem:[%s1208_s8 + $0x78] sm:$0xff]  ;;  %v331_v25 = vld [vmem:[%s1370_s5] sm:$0x7]  ;;  %s282_s8 = sand.u32 1, %s1083_s25  }
  0x1e   : > { %v956_v36 = vpack.c.bf16 %v314_v35, %v313_v34  ;;  %s786_s13 = sshll.u32 %s282_s8, 2  ;;  %s710_s20 = scalar_lea.sflag [#allocation3], %s282_s8 }
  0x1f   : > { %s284_s15 = scalar_lea.vmem [#allocation2], %s786_s13 }
  0x20   : > { %631 = vperm.xlu0 %1011, %v332_v18   ;;  %s723_s16 = sshll.u32 %s284_s15, 4  ;;  %s1325_s16 = int_to_ptr.vmem [resolvable:$true] %s723_s16 }
  0x21   : > { %s1029_s21 = scalar_lea.vmem %s1325_s16, 64  ;;  %p1036_p0 = scmp.lt.s32.totalorder %s1325_s16, %s1034_s22 }
  0x22   : > { %p1030_p11 = scmp.ne.s32.totalorder %s1325_s16, %s1029_s21  ;;  %p1037_p1 = scmp.lt.s32.totalorder %s1035_s23, %s1029_s21 }
  0x23   : > { %934 = vmatpush3.bf16.xpose.msk.msra.mxu0 %vm1214_vm2, %v932_v17 }
  0x24   : > { %935 = vmatprep.subr.bf16.mxu0 %v1093_v0  ;;  %p1031_p12 = pnand %p1030_p11, %p1176_p5  ;;  %p1038_p2 = por %p1037_p1, %p1036_p0 }
  0x26   : > { %p1032_p13 = pneg %p1031_p12 }
  0x28   : > { %p1039_p3 = pnand %p1038_p2, %p1032_p13 }
  0x2b   : > { %938 = vmatpush3.bf16.xpose.msk.msra.mxu0 %vm1214_vm2, %v936_v21 }
  0x2c   : > { %939 = vmatprep.subr.bf16.mxu0 %v1093_v0 }
  0x33   : > { %942 = vmatpush3.bf16.xpose.msk.msra.mxu0 %vm1214_vm2, %v940_v24 }
  0x34   : > { %943 = vmatprep.subr.bf16.mxu0 %v1093_v0 }
  0x3b   : > { %946 = vmatpush3.bf16.xpose.msk.msra.mxu0 %vm1214_vm2, %v944_v27 }
  0x3c   : > { %947 = vmatprep.subr.bf16.mxu0 %v1093_v0 }
  0x43   : > { %950 = vmatpush3.bf16.xpose.msk.msra.mxu0 %vm1214_vm2, %v948_v30 }
  0x44   : > { %951 = vmatprep.subr.bf16.mxu0 %v1093_v0 }
  0x4b   : > { %954 = vmatpush3.bf16.xpose.msk.msra.mxu0 %vm1214_vm2, %v952_v33 }
  0x4c   : > { %955 = vmatprep.subr.bf16.mxu0 %v1093_v0 }
  0x53   : > { %958 = vmatpush3.bf16.xpose.msk.msra.mxu0 %vm1214_vm2, %v956_v36 }
  0x5a   : > { %885 = vmatmul.mubr.msk.f32.vlgmr.msra.gmra.mrb[0].mxu0 %vm348_vm1, %v315_v37 }
  0x5b   : > { %887 = vmatprep.mubr.msk.f32.mxu0 %vm1094_vm0, %v1095_v1 }
  0x5e   : > { %888 = vmatmul.mubr.msk.f32.gmra.mrb[2].mxu0 %vm348_vm1, %v316_v38 }
  0x5f   : > { %890 = vmatprep.mubr.msk.f32.mxu0 %vm1094_vm0, %v1095_v1 }
  0x62   : > { %891 = vmatmul.mubr.msk.f32.gmra.mrb[4].mxu0 %vm348_vm1, %v317_v39 }
  0x8f   : > { %v336_v40 = vpop.permute.xlu0 %335 }
  0x90   : > { %v346_v48 = vpop.permute.xlu1 %345 }
  0x93   : > { %v341_v44 = vpop.permute.xlu0 %340 }
  0x94   : > { %v492_v62 = vpop.permute.xlu1 %491 }
  0x97   : > { %v497_v3 = vpop.permute.xlu0 %496 }
  0x98   : > { %v502_v8 = vpop.permute.xlu1 %501 }
  0x9b   : > { %v507_v11 = vpop.permute.xlu0 %506 }
  0x9c   : > { %v512_v16 = vpop.permute.xlu1 %511 }
 0x12d   : > { %v472_v41 = vpop.f32.mrb[0].mxu0 }
 0x12e   : > { %v886_v42 = vpop.f32.mrb[1].mxu0  ;;  %v473_v43 = vadd.f32 %v472_v41, %v336_v40 }
 0x130   : > { %1013 = vtanh.f32 %v473_v43 }
 0x131   : > { %v477_v45 = vpop.f32.mrb[2].mxu0 }
 0x132   : > { %v478_v46 = vadd.f32 %v477_v45, %v341_v44  ;;  %v889_v47 = vpop.f32.mrb[3].mxu0 }
 0x134   : > { %1015 = vtanh.f32 %v478_v46 }
 0x135   : > { %v482_v49 = vpop.f32.mrb[4].mxu0 }
 0x136   : > { %v483_v50 = vadd.f32 %v482_v49, %v346_v48  ;;  %v892_v51 = vpop.f32.mrb[5].mxu0 }
 0x138   : > { %1017 = vtanh.f32 %v483_v50 }
 0x13a   : > { %v1014_v52 = vpop.eup %1013 }
 0x13e   : > { %v1016_v53 = vpop.eup %1015 }
 0x13f   : > { %v960_v54 = vpack.c.bf16 %v1016_v53, %v1014_v52 }
 0x141   : > { %961 = vmatpush3.bf16.msra.mxu1 %v960_v54 }
 0x142   : > { %v1018_v55 = vpop.eup %1017  ;;  %897 = vmatprep.subr.mxu1 %v1095_v1 }
 0x145   : > { %898 = vmatpush3.msk.msra.mxu1 %vm530_vm3, %v1018_v55 }
 0x146   : > { %900 = vmatmul.mubr.msk.f32.vlgmr.msra.gmra.mrb[0].mxu1 %vm514_vm4, %v321_v56  ;;  %962 = vmatprep.subr.bf16.mxu1 %v1093_v0 }
 0x147   : > { %902 = vmatprep.mubr.msk.f32.mxu1 %vm1094_vm0, %v1095_v1 }
 0x14a   : > { %903 = vmatmul.mubr.msk.f32.gmra.mrb[2].mxu1 %vm514_vm4, %v322_v57 }
 0x14b   : > { %905 = vmatprep.mubr.msk.f32.mxu1 %vm1094_vm0, %v1095_v1 }
 0x14e   : > { %906 = vmatmul.mubr.msk.f32.gmra.mrb[4].mxu1 %vm514_vm4, %v323_v58 }
 0x14f   : > { %908 = vmatprep.mubr.msk.f32.mxu1 %vm1094_vm0, %v1095_v1 }
 0x152   : > { %909 = vmatmul.mubr.msk.f32.gmra.mrb[6].mxu1 %vm514_vm4, %v324_v59 }
 0x153   : > { %911 = vmatprep.mubr.msk.f32.mxu1 %vm1094_vm0, %v1095_v1 }
 0x156   : > { %912 = vmatmul.mubr.msk.f32.gmra.mrb[8].mxu1 %vm514_vm4, %v325_v60 }
 0x157   : > { %924 = vmatprep.mubr.msk.f32.mxu1 %vm1094_vm0, %v1095_v1 }
 0x219   : > { %v600_v61 = vpop.f32.mrb[0].mxu1 }
 0x21a   : > { %v901_v63 = vpop.f32.mrb[1].mxu1  ;;  %v601_v2 = vadd.f32 %v600_v61, %v492_v62 }
 0x21c   : > { %1019 = vtanh.f32 %v601_v2 }
 0x21d   : > { %v605_v4 = vpop.f32.mrb[2].mxu1 }
 0x21e   : > { %v606_v5 = vadd.f32 %v605_v4, %v497_v3  ;;  %v904_v6 = vpop.f32.mrb[3].mxu1 }
 0x220   : > { %1021 = vtanh.f32 %v606_v5 }
 0x221   : > { %v610_v7 = vpop.f32.mrb[4].mxu1 }
 0x222   : > { %v907_v9 = vpop.f32.mrb[5].mxu1  ;;  %v611_v10 = vadd.f32 %v610_v7, %v502_v8 }
 0x224   : > { %1023 = vtanh.f32 %v611_v10 }
 0x225   : > { %v615_v12 = vpop.f32.mrb[6].mxu1 }
 0x226   : > { %v616_v13 = vadd.f32 %v615_v12, %v507_v11  ;;  %v910_v14 = vpop.f32.mrb[7].mxu1  ;;  %v1020_v15 = vpop.eup %1019 }
 0x228   : > { %1025 = vtanh.f32 %v616_v13 }
 0x229   : > { %v620_v17 = vpop.f32.mrb[8].mxu1 }
 0x22a   : > { %v1022_v18 = vpop.eup %1021  ;;  %v621_v19 = vadd.f32 %v620_v17, %v512_v16  ;;  %v913_v20 = vpop.f32.mrb[9].mxu1 }
 0x22b   : > { %v963_v21 = vpack.c.bf16 %v1022_v18, %v1020_v15 }
 0x22c   : > { %1027 = vtanh.f32 %v621_v19 }
 0x22d   : > { %964 = vmatpush3.bf16.msra.mxu1 %v963_v21 }
 0x22e   : > { %965 = vmatprep.subr.bf16.mxu1 %v1093_v0  ;;  %v1024_v22 = vpop.eup %1023  ;;  %v632_v0 = vpop.permute.xlu0 %631 }
 0x232   : > { %v1026_v23 = vpop.eup %1025 }
 0x233   : > { %v966_v24 = vpack.c.bf16 %v1026_v23, %v1024_v22 }
 0x235   : > { %967 = vmatpush3.bf16.msra.mxu1 %v966_v24 }
 0x236   : > { %922 = vmatprep.subr.mxu1 %v1095_v1  ;;  %v1028_v26 = vpop.eup %1027 }
 0x239   : > { %923 = vmatpush3.msra.mxu1 %v1028_v26 }
 0x23a   : > { %925 = vmatmul.mubr.msk.f32.vlgmr.msra.gmra.mrb[10].mxu1 %vm634_vm5, %v331_v25 }
 0x30d   : > { %v704_v27 = vpop.f32.mrb[10].mxu1 }
 0x30e   : > { %v705_v28 = vadd.f32 %v704_v27, %v632_v0  ;;  %v926_v29 = vpop.f32.mrb[11].mxu1 }
 0x310   : > { %708 = vst [vmem:[%s284_s15] sm:$0x7] %v705_v28 }
 0x311   : > { %1042 = shalt.err (!%p1039_p3)
}
 0x312   : > { %s1043_s29 = scalar_lea.hbm %s1323_s19, 64  ;;  %s1047_s13 = scalar_lea.hbm %s1372_s7, 192 }
 0x313   : > { %p1044_p4 = scmp.ne.s32.totalorder %s1323_s19, %s1043_s29  ;;  %p1048_p9 = scmp.lt.u32.totalorder %s1323_s19, %s1372_s7 }
 0x314   : > { %p1049_p10 = scmp.lt.u32.totalorder %s1047_s13, %s1043_s29  ;;  %p1051_p12 = scmp.lt.u32.totalorder %s1043_s29, %s1323_s19 }
 0x315   : > { %p1045_p7 = pnand %p1044_p4, %p1176_p5 }
 0x316   : > { %p1050_p11 = por %p1049_p10, %p1048_p9 }
 0x317   : > { %p1046_p8 = pneg %p1045_p7 }
 0x318   : > { %p1052_p13 = por %p1051_p12, %p1050_p11 }
 0x31a   : > { %p1053_p0 = pnand %p1052_p13, %p1046_p8 }
 0x31c   : > { %1056 = shalt.err (!%p1053_p0)
}
 0x31d   : > { %968 = dma.vmem_to_hbm [thread:$0]  (%p1176_p5), %s1325_s16, 64, %s1323_s19, %s710_s20  }
 0x31e PF: > { %p974_p1 = scmp.ge.s32.totalorder %s1091_s27, 2  ;;  %s735_s17 = sand.u32 1, %s1079_s24  }
 0x31f   : > { %s736_s18 = scalar_lea.sflag [#allocation3], %s735_s17 }
 0x320   : > { %p971_p2 = pnand %p974_p1, %p1180_p6 }
 0x322   : > { %1074 = dma.done.wait (!%p971_p2), %s736_s18, 64  }
 0x323   : > { %1076 = vsyncadd (!%p971_p2), %s736_s18, 4294967232  ;;  %p17_p3 = scmp.ge.s32.totalorder %s1163_s30, 5   ;;  %s1377_s24 = smov %s1083_s25 }
 0x324   : > { %s1378_s25 = smov %s1087_s26  ;;  %s1379_s26 = smov %s1174_s10 }
 0x325   : > { %s1380_s27 = smov %s1163_s30  ;;  %19 = sbr.rel (!%p17_p3) target bundleno = 3 (0x3), region = 83 }
 0x32c   :  { %741 = vsyncpa [#allocation3], 1 }
 0x32d   :  { %743 = vsyncpa [#allocation3 + $0x1], 1 }

</bundles_post_ra>
